<compile_context>
chip_gen: v7x
topology: tpu7x:2x2x1
jax: 0.10.0
libtpu: 0.0.40
codegen_flags: <defaults>
</compile_context>

<pallas_src>
import functools
import math

import jax
import jax.numpy as jnp
from jax import lax
from jax.experimental import pallas as pl
from jax.experimental.pallas import tpu as pltpu


def conv_bn_gelu_kernel(p_ref, w_ref, shift_ref, o_ref):
    """One (batch element, row tile) per grid step.

    p_ref    : (1, row_tile, K_pad)   im2row patches, bf16, lane-padded to K_pad
    w_ref    : (K_pad, W*Cout)        block-Toeplitz conv weights with BN scale folded (bf16)
    shift_ref: (1, W*Cout)            folded conv-bias + BN shift, tiled over lanes (f32)
    o_ref    : (1, row_tile, W*Cout)  lane-dense output tile (f32)
    """
    patch = p_ref[0]                                                   # (row_tile, K_pad)
    # Single MXU matmul, bf16 operands, f32 accumulation.
    acc = jnp.dot(patch, w_ref[...], preferred_element_type=jnp.float32)
    y = acc + shift_ref[...]
    # Exact GELU: 0.5 * x * (1 + erf(x / sqrt(2)))  (matches nn.GELU(approximate='none')).
    y = 0.5 * y * (1.0 + lax.erf(y * (1.0 / math.sqrt(2.0))))
    o_ref[...] = y[None, :, :].astype(o_ref.dtype)


def prepare_conv_block_params(weight_hwio, bias, gamma, beta,
                              running_mean, running_var, W, eps=1e-5):
    """Hoisted parameter prep (depends only on weights / BN stats, not on x).

    Returns:
      w2      : (K_pad, W*Cout) bf16 block-Toeplitz weight matrix with BN scale folded in.
      shift_l : (1, W*Cout) f32 folded conv-bias + BN shift, tiled over lanes.
    """
    KH, KW, Cin, Cout = weight_hwio.shape
    assert KH == 3 and KW == 3, "module uses kernel_size=3, padding=1, stride=1"
    Wp = W + KW - 1
    lane_out = W * Cout
    K = KH * Wp * Cin
    K_pad = pl.cdiv(K, 128) * 128

    # Fold conv-bias + BatchNorm(eval) into one per-channel affine (f32).
    scale = gamma / jnp.sqrt(running_var + eps)                        # (Cout,)
    shift = (bias - running_mean) * scale + beta                       # (Cout,)

    # Block-Toeplitz weight matrix over W:
    #   w2[kh*Wp*Cin + wp*Cin + ci, w*Cout + co] = weight[kh, wp - w, ci, co]
    #   (zero outside the 3-wide band).
    wp_i = jnp.arange(Wp)[:, None, None]
    kw_i = jnp.arange(KW)[None, :, None]
    w_i = jnp.arange(W)[None, None, :]
    sel = (wp_i == w_i + kw_i).astype(weight_hwio.dtype)               # (Wp, KW, W)
    w2 = jnp.einsum("pkw,hkio->hpiwo", sel, weight_hwio)               # (KH,Wp,Cin,W,Cout)
    w2 = w2.reshape(K, lane_out)
    # Fold the BN scale into the output columns in f32, then cast once to bf16.
    w2 = w2 * jnp.tile(scale, W)[None, :]
    w2 = jnp.pad(w2, ((0, K_pad - K), (0, 0))).astype(jnp.bfloat16)

    shift_l = jnp.tile(shift, W).reshape(1, lane_out).astype(jnp.float32)
    return w2, shift_l


@functools.partial(jax.jit, static_argnames=("cout", "row_tile"))
def conv_block_forward(x_nchw, w2, shift_l, *, cout, row_tile=None):
    """ConvBlock forward. x_nchw: (N, Cin, H, W) float32 (PyTorch convention)."""
    N, Cin, H, W = x_nchw.shape
    KH = KW = 3
    Wp = W + KW - 1
    lane_out = W * cout
    K = KH * Wp * Cin
    K_pad = w2.shape[0]
    assert w2.shape == (K_pad, lane_out), w2.shape
    assert shift_l.shape == (1, lane_out), shift_l.shape
    assert lane_out % 128 == 0, "W*Cout must be a multiple of 128 for lane-dense stores"
    assert K_pad % 128 == 0 and K_pad >= K

    if row_tile is None:
        row_tile = H
    assert H % row_tile == 0, "H must be divisible by row_tile"
    assert row_tile % 8 == 0 or row_tile == H, "row_tile must be a multiple of 8"
    n_tiles = H // row_tile

    # ---- im2row pack (all fused by XLA under jit):
    #      NCHW -> padded NHWC -> per-output-row 3-row windows, lane-padded to K_pad.
    x_nhwc = jnp.transpose(x_nchw, (0, 2, 3, 1))
    xpad = jnp.pad(x_nhwc, ((0, 0), (1, 1), (1, 1), (0, 0)))           # (N, H+2, Wp, Cin)
    xrows = xpad.reshape(N, H + KH - 1, Wp * Cin)
    ridx = jnp.arange(H)[:, None] + jnp.arange(KH)[None, :]            # (H, KH)
    patches = xrows[:, ridx, :].reshape(N, H, K)                       # (N, H, K)
    patches = jnp.pad(patches, ((0, 0), (0, 0), (0, K_pad - K))).astype(jnp.bfloat16)

    out_packed = pl.pallas_call(
        conv_bn_gelu_kernel,
        out_shape=jax.ShapeDtypeStruct((N, H, lane_out), jnp.float32),
        grid_spec=pltpu.PrefetchScalarGridSpec(
            num_scalar_prefetch=0,
            grid=(N, n_tiles),
            in_specs=[
                pl.BlockSpec((1, row_tile, K_pad), lambda n, t: (n, t, 0)),
                pl.BlockSpec((K_pad, lane_out), lambda n, t: (0, 0)),
                pl.BlockSpec((1, lane_out), lambda n, t: (0, 0)),
            ],
            out_specs=pl.BlockSpec((1, row_tile, lane_out), lambda n, t: (n, t, 0)),
        ),
        compiler_params=pltpu.CompilerParams(
            dimension_semantics=("parallel", "parallel"),
        ),
    )(patches, w2, shift_l)

    # Unpack lanes back to channels and return PyTorch-style NCHW.
    out = out_packed.reshape(N, H, W, cout).transpose(0, 3, 1, 2)
    return out.astype(x_nchw.dtype)


def conv_block_reference(x_nchw, weight_hwio, bias, gamma, beta,
                         running_mean, running_var, eps=1e-5):
    """Plain-JAX reference matching PyTorch Conv2d+BatchNorm2d(eval)+GELU (f32)."""
    x_nhwc = jnp.transpose(x_nchw, (0, 2, 3, 1))
    z = lax.conv_general_dilated(
        x_nhwc, weight_hwio,
        window_strides=(1, 1), padding=((1, 1), (1, 1)),
        dimension_numbers=("NHWC", "HWIO", "NHWC"),
        precision=lax.Precision.HIGHEST,
    ) + bias
    z = (z - running_mean) / jnp.sqrt(running_var + eps) * gamma + beta
    z = 0.5 * z * (1.0 + lax.erf(z / jnp.sqrt(2.0).astype(z.dtype)))
    return jnp.transpose(z, (0, 3, 1, 2))


def conv_block_reference_folded(x_nchw, weight_folded_hwio, shift, eps=1e-5):
    """Reference using BN-scale-folded weights + shift (matches kernel numerics order)."""
    x_nhwc = jnp.transpose(x_nchw, (0, 2, 3, 1))
    z = lax.conv_general_dilated(
        x_nhwc, weight_folded_hwio,
        window_strides=(1, 1), padding=((1, 1), (1, 1)),
        dimension_numbers=("NHWC", "HWIO", "NHWC"),
        precision=lax.Precision.HIGHEST,
    ) + shift
    z = 0.5 * z * (1.0 + lax.erf(z / jnp.sqrt(2.0).astype(z.dtype)))
    return jnp.transpose(z, (0, 3, 1, 2))


if __name__ == "__main__":
    # Small shapes consistent with ConvBlock(in_fea=4, out_fea=8) on a 2x4x16x16 input.
    N, Cin, H, W = 2, 4, 16, 16
    Cout, KH, KW = 8, 3, 3

    key = jax.random.PRNGKey(0)
    kx, kw, kb, kg, kbt, km, kv = jax.random.split(key, 7)

    x = jax.random.normal(kx, (N, Cin, H, W), dtype=jnp.float32)

    fan_in = Cin * KH * KW
    bound = 1.0 / math.sqrt(fan_in)
    weight = jax.random.uniform(kw, (KH, KW, Cin, Cout), jnp.float32, -bound, bound)
    bias = jax.random.uniform(kb, (Cout,), jnp.float32, -bound, bound)
    gamma = 1.0 + 0.1 * jax.random.normal(kg, (Cout,), jnp.float32)
    beta = 0.1 * jax.random.normal(kbt, (Cout,), jnp.float32)
    running_mean = 0.1 * jax.random.normal(km, (Cout,), jnp.float32)
    running_var = jax.random.uniform(kv, (Cout,), jnp.float32, 0.5, 1.5)

    eps = 1e-5

    # Hoisted once per weight/BN update, reused across forwards.
    w2, shift_l = prepare_conv_block_params(weight, bias, gamma, beta,
                                            running_mean, running_var, W, eps=eps)
    w2, shift_l = jax.block_until_ready((w2, shift_l))

    out = conv_block_forward(x, w2, shift_l, cout=Cout)
    out = jax.block_until_ready(out)
    assert out.shape == (N, Cout, H, W), out.shape

    # Tight check: kernel (bf16 scale-folded weights, bf16 activations, f32 accumulation)
    # vs f32 reference evaluated on the same bf16-rounded folded weights/activations.
    scale = gamma / jnp.sqrt(running_var + eps)
    shift = (bias - running_mean) * scale + beta
    w_folded_bf16 = (weight * scale).astype(jnp.bfloat16).astype(jnp.float32)
    xb = x.astype(jnp.bfloat16).astype(jnp.float32)
    ref_matched = jax.block_until_ready(
        conv_block_reference_folded(xb, w_folded_bf16, shift, eps=eps))
    assert jnp.allclose(out, ref_matched, rtol=1e-3, atol=1e-3), \
        f"max abs err (bf16-rounded folded ref) = {jnp.max(jnp.abs(out - ref_matched))}"

    # Loose sanity check against the pure-f32 PyTorch-equivalent module.
    ref_f32 = jax.block_until_ready(conv_block_reference(
        x, weight, bias, gamma, beta, running_mean, running_var, eps=eps))
    assert jnp.allclose(out, ref_f32, rtol=5e-2, atol=5e-2), \
        f"max abs err (f32 ref) = {jnp.max(jnp.abs(out - ref_f32))}"

    print("KERNEL_OK")
</pallas_src>

<mosaic_0001>
module attributes {stable_mosaic.version = 11 : i64} {
  func.func @conv_bn_gelu_kernel(%arg0: i32, %arg1: i32, %arg2: memref<1x16x256xbf16, #tpu.memory_space<vmem>>, %arg3: memref<256x128xbf16, #tpu.memory_space<vmem>>, %arg4: memref<1x128xf32, #tpu.memory_space<vmem>>, %arg5: memref<1x16x128xf32, #tpu.memory_space<vmem>>) attributes {dimension_semantics = [#tpu.dimension_semantics<parallel>, #tpu.dimension_semantics<parallel>], iteration_bounds = array<i64: 2, 1>, scalar_prefetch = 0 : i64, scratch_operands = 0 : i64, tpu.core_type = #tpu.core_type<tc>, window_params = [{transform_indices = @transform_0, window_bounds = array<i64: 1, 16, 256>}, {pipeline_mode = #tpu.pipeline_mode<synchronous>, transform_indices = @transform_1, window_bounds = array<i64: 256, 128>}, {pipeline_mode = #tpu.pipeline_mode<synchronous>, transform_indices = @transform_2, window_bounds = array<i64: 1, 128>}, {transform_indices = @transform_3, window_bounds = array<i64: 1, 16, 128>}]} {
    %c0 = arith.constant 0 : index
    %c0_0 = arith.constant 0 : index
    %c0_1 = arith.constant 0 : index
    %0 = vector.load %arg2[%c0, %c0_0, %c0_1] : memref<1x16x256xbf16, #tpu.memory_space<vmem>>, vector<1x16x256xbf16>
    %1 = vector.shape_cast %0 : vector<1x16x256xbf16> to vector<16x256xbf16>
    %c0_2 = arith.constant 0 : index
    %c0_3 = arith.constant 0 : index
    %2 = vector.load %arg3[%c0_2, %c0_3] : memref<256x128xbf16, #tpu.memory_space<vmem>>, vector<256x128xbf16>
    %cst = arith.constant dense<0.000000e+00> : vector<16x128xf32>
    %3 = tpu.matmul %1, %2, %cst {dimension_numbers = #tpu.dot_dimension_numbers<[1], [0], [0], [1], [0, 0, 1, 1], [], []>} : vector<16x256xbf16>, vector<256x128xbf16>, vector<16x128xf32> -> vector<16x128xf32>
    %c0_4 = arith.constant 0 : index
    %c0_5 = arith.constant 0 : index
    %4 = vector.load %arg4[%c0_4, %c0_5] : memref<1x128xf32, #tpu.memory_space<vmem>>, vector<1x128xf32>
    %5 = vector.broadcast %4 : vector<1x128xf32> to vector<16x128xf32>
    %6 = arith.addf %3, %5 : vector<16x128xf32>
    %cst_6 = arith.constant 5.000000e-01 : f32
    %7 = vector.broadcast %cst_6 : f32 to vector<16x128xf32>
    %8 = arith.mulf %7, %6 : vector<16x128xf32>
    %cst_7 = arith.constant 0.707106769 : f32
    %9 = vector.broadcast %cst_7 : f32 to vector<16x128xf32>
    %10 = arith.mulf %6, %9 : vector<16x128xf32>
    %11 = math.erf %10 : vector<16x128xf32>
    %cst_8 = arith.constant 1.000000e+00 : f32
    %12 = vector.broadcast %cst_8 : f32 to vector<16x128xf32>
    %13 = arith.addf %12, %11 : vector<16x128xf32>
    %14 = arith.mulf %8, %13 : vector<16x128xf32>
    %15 = vector.shape_cast %14 : vector<16x128xf32> to vector<1x16x128xf32>
    %c0_9 = arith.constant 0 : index
    %c0_10 = arith.constant 0 : index
    %c0_11 = arith.constant 0 : index
    %16 = vector.load %arg5[%c0_9, %c0_10, %c0_11] : memref<1x16x128xf32, #tpu.memory_space<vmem>>, vector<1x16x128xf32>
    tpu.vector_store %arg5[%c0_9, %c0_10, %c0_11], %15 {strides = array<i32>} : memref<1x16x128xf32, #tpu.memory_space<vmem>>, vector<1x16x128xf32>,
    return
  }
  func.func @transform_0(%arg0: i32, %arg1: i32) -> (i32, i32, i32) {
    %c0_i32 = arith.constant 0 : i32
    %c0_i32_0 = arith.constant 0 : i32
    return %arg0, %arg1, %c0_i32 : i32, i32, i32
  }
  func.func @transform_1(%arg0: i32, %arg1: i32) -> (i32, i32) {
    %c0_i32 = arith.constant 0 : i32
    %c0_i32_0 = arith.constant 0 : i32
    %c0_i32_1 = arith.constant 0 : i32
    return %c0_i32, %c0_i32_0 : i32, i32
  }
  func.func @transform_2(%arg0: i32, %arg1: i32) -> (i32, i32) {
    %c0_i32 = arith.constant 0 : i32
    %c0_i32_0 = arith.constant 0 : i32
    %c0_i32_1 = arith.constant 0 : i32
    return %c0_i32, %c0_i32_0 : i32, i32
  }
  func.func @transform_3(%arg0: i32, %arg1: i32) -> (i32, i32, i32) {
    %c0_i32 = arith.constant 0 : i32
    %c0_i32_0 = arith.constant 0 : i32
    return %arg0, %arg1, %c0_i32 : i32, i32, i32
  }
}

</mosaic_0001>

<bundles_post_ra>
// kernel: conv_block_forward.1
= control target key start
LH: loop header
LB: loop body
LE: loop exit
PB: predicated region body
PF: predicated region fallthrough
CT: control target
= control target key end

     0   :  { %s649_s12 = smov 0   ;;  %s651_s13 = smov 0   ;;  %s740_s0 = inlined_call_operand.vmem [shape: bf16[2,16,256], index: 0, kind: input, shape index: {}]   ;;  %s741_s1 = inlined_call_operand.vmem [shape: bf16[256,128], index: 1, kind: input, shape index: {}]   ;;  %s742_s2 = inlined_call_operand.vmem [shape: f32[1,128], index: 2, kind: input, shape index: {}]   ;;  %s743_s3 = inlined_call_operand.vmem [shape: f32[2,16,128], index: 3, kind: output, shape index: {}]  }
   0x1   :  { %s653_s14 = smov 0  }
   0x2 LB: > { %s25_s15 = sadd.s32 1, %s623_s13  ;;  %p508_p0 = scmp.ge.s32.totalorder %s627_s14, 1  ;;  %s627_s14 = sphi %s653_s14, %s13_s14   ;;  %s623_s13 = sphi %s651_s13, %s745_s13   ;;  %s619_s12 = sphi %s649_s12, %s744_s12  }
   0x3   : > { %p27_p1 = scmp.ge.s32.totalorder %s25_s15, 2  ;;  %p159_p2 = scmp.lt.s32.totalorder %s627_s14, 3 }
   0x5   : > { %s747_s15 = smov (%p27_p1, %s25_s15), 0  ;;  %p160_p3 = pnand %p508_p0, %p159_p2 }
   0x6   : > { %v582_v0 = vld [vmem:[%s741_s1 + $0x40] sm:$0xff] (!%p160_p3)   ;;  %v584_v2 = vld [vmem:[%s741_s1 + $0x48] sm:$0xff] (!%p160_p3)   ;;  %p193_p4 = scmp.lt.s32.totalorder (!%p160_p3), %s619_s12, 1  ;;  %v586_v4 = vld [vmem:[%s741_s1 + $0x50] sm:$0xff] (!%p160_p3)  }
   0x7   : > { %163 = sbr.rel (%p160_p3) target bundleno = 276 (0x114), region = 32  ;;  %v583_v1 = vld [vmem:[%s741_s1] sm:$0xff] (!%p160_p3)   ;;  %536 = vmatprep.subr.bf16.mxu0 (!%p160_p3), %v582_v0  ;;  %v585_v3 = vld [vmem:[%s741_s1 + $0x8] sm:$0xff] (!%p160_p3)   ;;  %v587_v5 = vld [vmem:[%s741_s1 + $0x10] sm:$0xff] (!%p160_p3)  }
   0x8   : > { %537 = vmatpush3.bf16.msra.mxu0 (!%p160_p3), %v583_v1  ;;  %v588_v6 = vld [vmem:[%s741_s1 + $0x58] sm:$0xff] (!%p160_p3)   ;;  %v590_v8 = vld [vmem:[%s741_s1 + $0x60] sm:$0xff] (!%p160_p3)   ;;  %v592_v10 = vld [vmem:[%s741_s1 + $0x68] sm:$0xff] (!%p160_p3)  }
   0x9   : > { %538 = vmatprep.subr.bf16.mxu0 (!%p160_p3), %v584_v2  ;;  %v589_v7 = vld [vmem:[%s741_s1 + $0x18] sm:$0xff] (!%p160_p3)   ;;  %v591_v9 = vld [vmem:[%s741_s1 + $0x20] sm:$0xff] (!%p160_p3)   ;;  %v593_v12 = vld [vmem:[%s741_s1 + $0x28] sm:$0xff] (!%p160_p3)  }
   0xa   : > { %v594_v13 = vld [vmem:[%s741_s1 + $0x70] sm:$0xff] (!%p160_p3)   ;;  %v596_v15 = vld [vmem:[%s741_s1 + $0x78] sm:$0xff] (!%p160_p3)   ;;  %v513_v19 = vld [vmem:[%s742_s2] ss:$0 sm:$0xff] (!%p160_p3) }
   0xb   : > { %v595_v14 = vld [vmem:[%s741_s1 + $0x30] sm:$0xff] (!%p160_p3)   ;;  %v597_v16 = vld [vmem:[%s741_s1 + $0x38] sm:$0xff] (!%p160_p3)  }
   0xc   : > { %539 = vmatpush3.bf16.msra.mxu0 (!%p160_p3), %v585_v3 }
   0xd   : > { %540 = vmatprep.subr.bf16.mxu0 (!%p160_p3), %v586_v4 }
   0xe   : > { %s749_s12 = smov (!%p193_p4, %s619_s12), 1 }
   0xf   : > { %s534_s5 = sshll.u32 %s749_s12, 4 }
  0x10   : > { %541 = vmatpush3.bf16.msra.mxu0 %v587_v5  ;;  %s201_s10 = scalar_lea.vmem %s740_s0, %s534_s5  ;;  %s211_s7 = scalar_lea.vmem %s743_s3, %s534_s5 }
  0x11   : > { %542 = vmatprep.subr.bf16.mxu0 %v588_v6  ;;  %v600_v11 = vld [vmem:[%s201_s10 + $0x4] ss:$8 sps:$4 sm:$0xff]   ;;  %v598_v17 = vld [vmem:[%s201_s10] ss:$8 sps:$4 sm:$0xff]  }
  0x12   : > { %393 = vmatprep.mubr.bf16.mxu0 %v600_v11 }
  0x14   : > { %543 = vmatpush3.bf16.msra.mxu0 %v589_v7 }
  0x15   : > { %544 = vmatprep.subr.bf16.mxu0 %v590_v8 }
  0x18   : > { %545 = vmatpush3.bf16.msra.mxu0 %v591_v9 }
  0x19   : > { %546 = vmatprep.subr.bf16.mxu0 %v592_v10 }
  0x1c   : > { %547 = vmatpush3.bf16.msra.mxu0 %v593_v12 }
  0x1d   : > { %548 = vmatprep.subr.bf16.mxu0 %v594_v13 }
  0x20   : > { %549 = vmatpush3.bf16.msra.mxu0 %v595_v14 }
  0x21   : > { %550 = vmatprep.subr.bf16.mxu0 %v596_v15 }
  0x24   : > { %551 = vmatpush3.bf16.msra.mxu0 %v597_v16 }
  0x27   : > { %394 = vmatmul.mubr.bf16.vlgmr.msra.gmra.mrb[0].mxu0 %v598_v17 }
  0xfa   : > { %v552_v18 = vpop.f32.mrb[0].mxu0 }
  0xfb   : > { %v553_v20 = vpop.f32.mrb[1].mxu0 }
  0xfc   : > { %v554_v21 = vadd.f32 %v553_v20, %v552_v18  ;;  %v555_v22 = vpop.f32.mrb[2].mxu0 }
  0xfd   : > { %v556_v23 = vpop.f32.mrb[3].mxu0 }
  0xfe   : > { %v396_v24 = vadd.f32 %v554_v21, %v513_v19  ;;  %v557_v25 = vadd.f32 %v556_v23, %v555_v22 }
 0x100   : > { %v404_v26 = vmul.f32 0.70710677, %v396_v24  ;;  %v399_v27 = vadd.f32 %v557_v25, %v513_v19  ;;  %v402_v30 = vmul.f32 0.5, %v396_v24 }
 0x102   : > { %601 = verf.f32 %v404_v26  ;;  %v405_v28 = vmul.f32 0.70710677, %v399_v27  ;;  %v403_v34 = vmul.f32 0.5, %v399_v27 }
 0x104   : > { %603 = verf.f32 %v405_v28 }
 0x10c   : > { %v602_v29 = vpop.eup %601 }
 0x10d   : > { %v408_v31 = vadd.f32 1.0, %v602_v29 }
 0x10e   : > { %v604_v32 = vpop.eup %603 }
 0x10f   : > { %v410_v33 = vmul.f32 %v408_v31, %v402_v30  ;;  %v409_v35 = vadd.f32 1.0, %v604_v32 }
 0x111   : > { %412 = vst [vmem:[%s211_s7] sm:$0xff] %v410_v33  ;;  %v411_v36 = vmul.f32 %v409_v35, %v403_v34 }
 0x113   : > { %413 = vst [vmem:[%s211_s7 + $0x8] sm:$0xff] %v411_v36 }
 0x114 PF: > { %s13_s14 = sadd.s32 1, %s627_s14   ;;  %s744_s12 = smov %s623_s13 }
 0x115   : > { %p10_p5 = scmp.ge.s32.totalorder %s13_s14, 4   ;;  %s745_s13 = smov %s747_s15 }
 0x117   :  { %12 = sbr.rel (!%p10_p5) target bundleno = 2 (0x2), region = 62 }

</bundles_post_ra>
